<compile_context>
chip_gen: v6e
topology: v6e:2x2x1
jax: 0.10.0
libtpu: 0.0.40
codegen_flags: <defaults>
</compile_context>

<pallas_src>
import jax
import jax.numpy as jnp
from jax.experimental import pallas as pl
from jax.experimental.pallas import tpu as pltpu


def _head_kernel(x_ref, w1_ref, b1_ref, w2_ref, b2_ref, o_ref):
    # x_ref : [B, S, D]
    # w1_ref: [D, D],  b1_ref: [1, D]
    # w2_ref: [D, Cp], b2_ref: [1, Cp]   (Cp = C padded to a multiple of 128)
    # o_ref : [B, Cp]
    x = x_ref[...]                                   # native dtype
    s = x_ref.shape[1]

    # transpose(1,2) + AdaptiveAvgPool1d(1) == mean over the S axis.
    # Accumulate in f32, scale by the compile-time constant 1/S (no divide),
    # then return to the native dtype so the MXU sees native operands.
    pooled = jnp.sum(x.astype(jnp.float32), axis=1) * jnp.float32(1.0 / s)
    pooled = pooled.astype(x.dtype)                  # [B, D]

    # Linear(D, D) + bias (f32 accumulation on the MXU).
    h = jnp.dot(pooled, w1_ref[...], preferred_element_type=jnp.float32)
    h = h + b1_ref[...].astype(jnp.float32)          # broadcast [1, D]

    # Exact GELU (erf-based), matching torch.nn.GELU() default.
    h = 0.5 * h * (1.0 + jax.lax.erf(h * jnp.float32(0.7071067811865476)))

    # Dropout(0.2): identity at inference time.

    # Linear(D, num_classes) + bias.
    out = jnp.dot(h.astype(x.dtype), w2_ref[...],
                  preferred_element_type=jnp.float32)
    out = out + b2_ref[...].astype(jnp.float32)      # broadcast [1, Cp]

    o_ref[...] = out.astype(o_ref.dtype)


def classification_head(x, w1, b1, w2, b2):
    """x: [B, S, D]; w1: [D, D]; b1: [D]; w2: [D, C]; b2: [C] -> [B, C]."""
    B, S, D = x.shape
    C = w2.shape[1]

    # Lane-dense output: pad class dim up to a multiple of 128.
    C_pad = ((C + 127) // 128) * 128
    w2p = jnp.pad(w2, ((0, 0), (0, C_pad - C)))
    b2p = jnp.pad(b2, (0, C_pad - C)).reshape(1, C_pad)
    b1r = b1.reshape(1, D)

    vmem = pltpu.MemorySpace.VMEM
    out_padded = pl.pallas_call(
        _head_kernel,
        out_shape=jax.ShapeDtypeStruct((B, C_pad), x.dtype),
        in_specs=[
            pl.BlockSpec(memory_space=vmem),   # x
            pl.BlockSpec(memory_space=vmem),   # w1
            pl.BlockSpec(memory_space=vmem),   # b1
            pl.BlockSpec(memory_space=vmem),   # w2 (padded)
            pl.BlockSpec(memory_space=vmem),   # b2 (padded)
        ],
        out_specs=pl.BlockSpec(memory_space=vmem),
    )(x, w1, b1r, w2p, b2p)

    return out_padded[:, :C]


def reference(x, w1, b1, w2, b2):
    pooled = jnp.mean(x, axis=1)
    h = pooled @ w1 + b1
    h = 0.5 * h * (1.0 + jax.lax.erf(h / jnp.sqrt(2.0)))
    return h @ w2 + b2


if __name__ == "__main__":
    key = jax.random.PRNGKey(0)
    B, S, D, C = 2, 9, 128, 9   # x: [B, 9, D] as in the module docstring

    kx, k1, k2, k3, k4 = jax.random.split(key, 5)
    x = jax.random.normal(kx, (B, S, D), dtype=jnp.float32)

    # Deterministic parameter init (uniform, like PyTorch's default Linear init scale).
    lim1 = 1.0 / (D ** 0.5)
    w1 = jax.random.uniform(k1, (D, D), jnp.float32, -lim1, lim1)
    b1 = jax.random.uniform(k2, (D,), jnp.float32, -lim1, lim1)
    w2 = jax.random.uniform(k3, (D, C), jnp.float32, -lim1, lim1)
    b2 = jax.random.uniform(k4, (C,), jnp.float32, -lim1, lim1)

    out = classification_head(x, w1, b1, w2, b2)
    out = jax.block_until_ready(out)

    ref = reference(x, w1, b1, w2, b2)
    assert out.shape == (B, C)
    assert jnp.allclose(out, ref, atol=1e-4, rtol=1e-4), "mismatch vs reference"

    print("KERNEL_OK")
</pallas_src>

<mosaic_0001>
module attributes {stable_mosaic.version = 11 : i64} {
  func.func @_head_kernel(%arg0: memref<2x9x128xf32, #tpu.memory_space<vmem>>, %arg1: memref<128x128xf32, #tpu.memory_space<vmem>>, %arg2: memref<1x128xf32, #tpu.memory_space<vmem>>, %arg3: memref<128x128xf32, #tpu.memory_space<vmem>>, %arg4: memref<1x128xf32, #tpu.memory_space<vmem>>, %arg5: memref<2x128xf32, #tpu.memory_space<vmem>>) attributes {dimension_semantics = [], scalar_prefetch = 0 : i64, scratch_operands = 0 : i64, tpu.core_type = #tpu.core_type<tc>} {
    %c0 = arith.constant 0 : index
    %c0_0 = arith.constant 0 : index
    %c0_1 = arith.constant 0 : index
    %0 = vector.load %arg0[%c0, %c0_0, %c0_1] : memref<2x9x128xf32, #tpu.memory_space<vmem>>, vector<2x9x128xf32>
    %cst = arith.constant dense<0.000000e+00> : vector<2x128xf32>
    %1 = vector.multi_reduction <add>, %0, %cst [1] : vector<2x9x128xf32> to vector<2x128xf32>
    %cst_2 = arith.constant 0.111111112 : f32
    %2 = vector.broadcast %cst_2 : f32 to vector<2x128xf32>
    %3 = arith.mulf %1, %2 : vector<2x128xf32>
    %c0_3 = arith.constant 0 : index
    %c0_4 = arith.constant 0 : index
    %4 = vector.load %arg1[%c0_3, %c0_4] : memref<128x128xf32, #tpu.memory_space<vmem>>, vector<128x128xf32>
    %cst_5 = arith.constant dense<0.000000e+00> : vector<2x128xf32>
    %5 = tpu.matmul %3, %4, %cst_5 {dimension_numbers = #tpu.dot_dimension_numbers<[1], [0], [0], [1], [0, 0, 1, 1], [], []>} : vector<2x128xf32>, vector<128x128xf32>, vector<2x128xf32> -> vector<2x128xf32>
    %c0_6 = arith.constant 0 : index
    %c0_7 = arith.constant 0 : index
    %6 = vector.load %arg2[%c0_6, %c0_7] : memref<1x128xf32, #tpu.memory_space<vmem>>, vector<1x128xf32>
    %7 = vector.broadcast %6 : vector<1x128xf32> to vector<2x128xf32>
    %8 = arith.addf %5, %7 : vector<2x128xf32>
    %cst_8 = arith.constant 5.000000e-01 : f32
    %9 = vector.broadcast %cst_8 : f32 to vector<2x128xf32>
    %10 = arith.mulf %9, %8 : vector<2x128xf32>
    %cst_9 = arith.constant 0.707106769 : f32
    %11 = vector.broadcast %cst_9 : f32 to vector<2x128xf32>
    %12 = arith.mulf %8, %11 : vector<2x128xf32>
    %13 = math.erf %12 : vector<2x128xf32>
    %cst_10 = arith.constant 1.000000e+00 : f32
    %14 = vector.broadcast %cst_10 : f32 to vector<2x128xf32>
    %15 = arith.addf %14, %13 : vector<2x128xf32>
    %16 = arith.mulf %10, %15 : vector<2x128xf32>
    %c0_11 = arith.constant 0 : index
    %c0_12 = arith.constant 0 : index
    %17 = vector.load %arg3[%c0_11, %c0_12] : memref<128x128xf32, #tpu.memory_space<vmem>>, vector<128x128xf32>
    %cst_13 = arith.constant dense<0.000000e+00> : vector<2x128xf32>
    %18 = tpu.matmul %16, %17, %cst_13 {dimension_numbers = #tpu.dot_dimension_numbers<[1], [0], [0], [1], [0, 0, 1, 1], [], []>} : vector<2x128xf32>, vector<128x128xf32>, vector<2x128xf32> -> vector<2x128xf32>
    %c0_14 = arith.constant 0 : index
    %c0_15 = arith.constant 0 : index
    %19 = vector.load %arg4[%c0_14, %c0_15] : memref<1x128xf32, #tpu.memory_space<vmem>>, vector<1x128xf32>
    %20 = vector.broadcast %19 : vector<1x128xf32> to vector<2x128xf32>
    %21 = arith.addf %18, %20 : vector<2x128xf32>
    %c0_16 = arith.constant 0 : index
    %c0_17 = arith.constant 0 : index
    %22 = vector.load %arg5[%c0_16, %c0_17] : memref<2x128xf32, #tpu.memory_space<vmem>>, vector<2x128xf32>
    tpu.vector_store %arg5[%c0_16, %c0_17], %21 {strides = array<i32>} : memref<2x128xf32, #tpu.memory_space<vmem>>, vector<2x128xf32>,
    return
  }
}

</mosaic_0001>

<bundles_post_ra>
// kernel: tpu_custom_call.1
= control target key start
LH: loop header
LB: loop body
LE: loop exit
PB: predicated region body
PF: predicated region fallthrough
CT: control target
= control target key end

     0   :  { %10 = vsyncpa [#allocation3], 0  ;;  %s564_s0 = inlined_call_operand.vmem [shape: f32[2,9,128], index: 0, kind: input, shape index: {}]   ;;  %s565_s1 = inlined_call_operand.hbm [shape: f32[128,128], index: 1, kind: input, shape index: {}]   ;;  %s566_s2 = inlined_call_operand.vmem [shape: f32[1,128], index: 2, kind: input, shape index: {}]   ;;  %s567_s3 = inlined_call_operand.hbm [shape: f32[128,128], index: 3, kind: input, shape index: {}]   ;;  %s568_s4 = inlined_call_operand.vmem [shape: f32[1,128], index: 4, kind: input, shape index: {}]   ;;  %s569_s5 = inlined_call_operand.hbm [shape: f32[2,128], index: 5, kind: output, shape index: {}]  }
   0x1   :  { %11 = vsyncpa [#allocation6], 0 }
   0x2   :  { %12 = vsyncpa [#allocation4], 0  ;;  %s466_s18 = smov [#allocation2]  }
   0x3   :  { %s20_s19 = sshll.u32 %s466_s18, 4  ;;  %s21_s19 = int_to_ptr.vmem [resolvable:$true] %s20_s19 }
   0x4   :  { %s408_s20 = scalar_lea.vmem %s21_s19, 2048  ;;  %p413_p1 = scmp.lt.s32.totalorder %s21_s19, %s21_s19 }
   0x5   :  { %p409_p0 = scmp.ne.s32.totalorder %s21_s19, %s408_s20  ;;  %p414_p2 = scmp.lt.s32.totalorder %s408_s20, %s408_s20 }
   0x7   :  { %p415_p3 = por %p414_p2, %p413_p1 }
   0x9   :  { %p416_p4 = pnand %p415_p3, %p409_p0 }
   0xb   :  { %419 = shalt.err (!%p416_p4)
}
   0xc   :  { %s467_s21 = smov 128   ;;  %s468_s22 = smov 8  }
   0xd   :  { %26 = dma.hbm_to_vmem [thread:$0]  %s565_s1, 2048, %s21_s19, [#allocation3], %s467_s21, %s467_s21, %s468_s22  }
   0xe   :  { %s469_s25 = smov [#allocation5]  }
   0xf   :  { %s34_s26 = sshll.u32 %s469_s25, 4  ;;  %s35_s26 = int_to_ptr.vmem [resolvable:$true] %s34_s26 }
  0x10   :  { %s428_s27 = scalar_lea.vmem %s35_s26, 2048  ;;  %p433_p6 = scmp.lt.s32.totalorder %s35_s26, %s35_s26 }
  0x11   :  { %p429_p5 = scmp.ne.s32.totalorder %s35_s26, %s428_s27  ;;  %p434_p7 = scmp.lt.s32.totalorder %s428_s27, %s428_s27 }
  0x13   :  { %p435_p8 = por %p434_p7, %p433_p6 }
  0x15   :  { %p436_p9 = pnand %p435_p8, %p429_p5 }
  0x17   :  { %439 = shalt.err (!%p436_p9)
}
  0x18   :  { %40 = dma.hbm_to_vmem [thread:$0]  %s567_s3, 2048, %s35_s26, [#allocation6], %s467_s21, %s467_s21, %s468_s22  }
  0x19   :  { %460 = dma.done.wait [#allocation3], 2048  }
  0x1a   :  { %461 = vsyncadd [#allocation3], 4294965248 }
  0x1b   :  { %462 = dma.done.wait [#allocation6], 2048  }
  0x1c   :  { %463 = vsyncadd [#allocation6], 4294965248  ;;  %v470_v0 = vmov 0.0   ;;  %vm471_vm0 = vmmov 0   ;;  %v87_v1 = vld [vmem:[#allocation2 + $0x78] sm:$0xff]  ;;  %v86_v2 = vld [vmem:[#allocation2 + $0x70] sm:$0xff] }
  0x1d   :  { %321 = vmatprep.subr.mxu0 %v470_v0  ;;  %353 = vmatprep.mubr.msk.f32.mxu0 %vm471_vm0, %v470_v0  ;;  %v85_v3 = vld [vmem:[#allocation2 + $0x68] sm:$0xff]  ;;  %vm53_vm1 = vcmask 1040384   ;;  %v84_v4 = vld [vmem:[#allocation2 + $0x60] sm:$0xff]  ;;  %v83_v5 = vld [vmem:[#allocation2 + $0x58] sm:$0xff]  ;;  %vm97_vm2 = vcmask 1041409   ;;  %s472_s14 = smov [#allocation7]  }
  0x1e   :  { %356 = vmatprep.subr.mxu1 %v470_v0  ;;  %388 = vmatprep.mubr.msk.f32.mxu1 %vm471_vm0, %v470_v0  ;;  %v49_v6 = vld [vmem:[%s564_s0] sm:$0xff]  ;;  %v50_v7 = vld [vmem:[%s564_s0 + $0x8] sm:$0x1]  ;;  %v51_v8 = vld [vmem:[%s564_s0 + $0x10] sm:$0xff]  ;;  %s275_s15 = sshll.u32 %s472_s14, 4  ;;  %s276_s15 = int_to_ptr.vmem [resolvable:$true] %s275_s15 }
  0x1f   :  { %322 = vmatpush3.msra.mxu0 %v87_v1  ;;  %v52_v9 = vld [vmem:[%s564_s0 + $0x18] sm:$0x1]  ;;  %v54_v10 = vsel %vm53_vm1, %v50_v7, 0.0  ;;  %v189_v14 = vld [vmem:[#allocation5 + $0x70] sm:$0xff]  ;;  %v188_v17 = vld [vmem:[#allocation5 + $0x68] sm:$0xff]  ;;  %p445_p11 = scmp.lt.s32.totalorder %s276_s15, %s276_s15 }
  0x20   :  { %323 = vmatprep.subr.mxu0 %v470_v0  ;;  %v190_v11 = vld [vmem:[#allocation5 + $0x78] sm:$0xff]  ;;  %v55_v12 = vadd.f32 %v54_v10, %v49_v6  ;;  %v62_v13 = vsel %vm53_vm1, %v52_v9, 0.0  ;;  %v82_v15 = vld [vmem:[#allocation2 + $0x50] sm:$0xff]  ;;  %v81_v19 = vld [vmem:[#allocation2 + $0x48] sm:$0xff] }
  0x21   :  { %324 = vmatpush3.msra.mxu0 %v86_v2  ;;  %357 = vmatpush3.msra.mxu1 %v190_v11  ;;  %v63_v16 = vadd.f32 %v62_v13, %v51_v8  ;;  %v187_v21 = vld [vmem:[#allocation5 + $0x60] sm:$0xff]  ;;  %v79_v26 = vld [vmem:[#allocation2 + $0x38] sm:$0xff]  ;;  %v78_v29 = vld [vmem:[#allocation2 + $0x30] sm:$0xff] }
  0x22   :  { %325 = vmatprep.subr.mxu0 %v470_v0  ;;  %358 = vmatprep.subr.mxu1 %v470_v0  ;;  %v56_v18 = vrot.slane %v55_v12, 4  ;;  %v80_v23 = vld [vmem:[#allocation2 + $0x40] sm:$0xff]  ;;  %v77_v32 = vld [vmem:[#allocation2 + $0x28] sm:$0xff]  ;;  %v75_v37 = vld [vmem:[#allocation2 + $0x18] sm:$0xff] }
  0x23   :  { %326 = vmatpush3.msra.mxu0 %v85_v3  ;;  %359 = vmatpush3.msra.mxu1 %v189_v14  ;;  %v64_v20 = vrot.slane %v63_v16, 4  ;;  %v76_v34 = vld [vmem:[#allocation2 + $0x20] sm:$0xff]  ;;  %v74_v38 = vld [vmem:[#allocation2 + $0x10] sm:$0xff]  ;;  %v73_v41 = vld [vmem:[#allocation2 + $0x8] sm:$0xff] }
  0x24   :  { %327 = vmatprep.subr.mxu0 %v470_v0  ;;  %360 = vmatprep.subr.mxu1 %v470_v0  ;;  %v57_v22 = vadd.f32 %v56_v18, %v55_v12  ;;  %v72_v42 = vld [vmem:[#allocation2] sm:$0xff]  ;;  %v186_v44 = vld [vmem:[#allocation5 + $0x58] sm:$0xff]  ;;  %v185_v45 = vld [vmem:[#allocation5 + $0x50] sm:$0xff] }
  0x25   :  { %328 = vmatpush3.msra.mxu0 %v84_v4  ;;  %361 = vmatpush3.msra.mxu1 %v188_v17  ;;  %v65_v24 = vadd.f32 %v64_v20, %v63_v16  ;;  %v184_v46 = vld [vmem:[#allocation5 + $0x48] sm:$0xff]  ;;  %v183_v47 = vld [vmem:[#allocation5 + $0x40] sm:$0xff]  ;;  %v182_v48 = vld [vmem:[#allocation5 + $0x38] sm:$0xff] }
  0x26   :  { %329 = vmatprep.subr.mxu0 %v470_v0  ;;  %362 = vmatprep.subr.mxu1 %v470_v0  ;;  %v58_v25 = vrot.slane %v57_v22, 2  ;;  %v181_v49 = vld [vmem:[#allocation5 + $0x30] sm:$0xff]  ;;  %v180_v50 = vld [vmem:[#allocation5 + $0x28] sm:$0xff]  ;;  %v179_v51 = vld [vmem:[#allocation5 + $0x20] sm:$0xff] }
  0x27   :  { %330 = vmatpush3.msra.mxu0 %v83_v5  ;;  %363 = vmatpush3.msra.mxu1 %v187_v21  ;;  %v66_v27 = vrot.slane %v65_v24, 2  ;;  %v178_v52 = vld [vmem:[#allocation5 + $0x18] sm:$0xff]  ;;  %v177_v53 = vld [vmem:[#allocation5 + $0x10] sm:$0xff]  ;;  %v176_v54 = vld [vmem:[#allocation5 + $0x8] sm:$0xff] }
  0x28   :  { %331 = vmatprep.subr.mxu0 %v470_v0  ;;  %364 = vmatprep.subr.mxu1 %v470_v0  ;;  %v59_v28 = vadd.f32 %v58_v25, %v57_v22  ;;  %v175_v55 = vld [vmem:[#allocation5] sm:$0xff] }
  0x29   :  { %332 = vmatpush3.msra.mxu0 %v82_v15  ;;  %v67_v30 = vadd.f32 %v66_v27, %v65_v24  ;;  %365 = vmatpush3.msra.mxu1 %v186_v44  ;;  %v285_v56 = vld [vmem:[%s566_s2] ss:$0 sm:$0xff]  ;;  %s440_s2 = scalar_lea.vmem %s276_s15, 32 }
  0x2a   :  { %333 = vmatprep.subr.mxu0 %v470_v0  ;;  %v60_v31 = vrot.slane %v59_v28, 1  ;;  %366 = vmatprep.subr.mxu1 %v470_v0  ;;  %v286_v2 = vld [vmem:[%s568_s4] ss:$0 sm:$0xff]  ;;  %p441_p10 = scmp.ne.s32.totalorder %s276_s15, %s440_s2  ;;  %p446_p12 = scmp.lt.s32.totalorder %s440_s2, %s440_s2 }
  0x2b   :  { %334 = vmatpush3.msra.mxu0 %v81_v19  ;;  %v68_v33 = vrot.slane %v67_v30, 1  ;;  %367 = vmatpush3.msra.mxu1 %v185_v45 }
  0x2c   :  { %335 = vmatprep.subr.mxu0 %v470_v0  ;;  %v61_v35 = vadd.f32 %v60_v31, %v59_v28  ;;  %368 = vmatprep.subr.mxu1 %v470_v0  ;;  %p447_p13 = por %p446_p12, %p445_p11 }
  0x2d   :  { %336 = vmatpush3.msra.mxu0 %v80_v23  ;;  %v69_v36 = vadd.f32 %v68_v33, %v67_v30  ;;  %369 = vmatpush3.msra.mxu1 %v184_v46 }
  0x2e   :  { %337 = vmatprep.subr.mxu0 %v470_v0  ;;  %v70_v39 = vmul.f32 0.11111111, %v61_v35  ;;  %370 = vmatprep.subr.mxu1 %v470_v0  ;;  %p448_p0 = pnand %p447_p13, %p441_p10 }
  0x2f   :  { %338 = vmatpush3.msra.mxu0 %v79_v26  ;;  %v71_v40 = vmul.f32 0.11111111, %v69_v36  ;;  %371 = vmatpush3.msra.mxu1 %v183_v47 }
  0x30   :  { %339 = vmatprep.subr.mxu0 %v470_v0  ;;  %372 = vmatprep.subr.mxu1 %v470_v0 }
  0x31   :  { %340 = vmatpush3.msra.mxu0 %v78_v29  ;;  %v98_v43 = vsel %vm97_vm2, %v71_v40, %v70_v39  ;;  %373 = vmatpush3.msra.mxu1 %v182_v48 }
  0x32   :  { %341 = vmatprep.subr.mxu0 %v470_v0  ;;  %374 = vmatprep.subr.mxu1 %v470_v0 }
  0x33   :  { %342 = vmatpush3.msra.mxu0 %v77_v32  ;;  %375 = vmatpush3.msra.mxu1 %v181_v49 }
  0x34   :  { %343 = vmatprep.subr.mxu0 %v470_v0  ;;  %376 = vmatprep.subr.mxu1 %v470_v0 }
  0x35   :  { %344 = vmatpush3.msra.mxu0 %v76_v34  ;;  %377 = vmatpush3.msra.mxu1 %v180_v50 }
  0x36   :  { %345 = vmatprep.subr.mxu0 %v470_v0  ;;  %378 = vmatprep.subr.mxu1 %v470_v0 }
  0x37   :  { %346 = vmatpush3.msra.mxu0 %v75_v37  ;;  %379 = vmatpush3.msra.mxu1 %v179_v51 }
  0x38   :  { %347 = vmatprep.subr.mxu0 %v470_v0  ;;  %380 = vmatprep.subr.mxu1 %v470_v0 }
  0x39   :  { %348 = vmatpush3.msra.mxu0 %v74_v38  ;;  %381 = vmatpush3.msra.mxu1 %v178_v52 }
  0x3a   :  { %349 = vmatprep.subr.mxu0 %v470_v0  ;;  %382 = vmatprep.subr.mxu1 %v470_v0 }
  0x3b   :  { %350 = vmatpush3.msra.mxu0 %v73_v41  ;;  %383 = vmatpush3.msra.mxu1 %v177_v53 }
  0x3c   :  { %351 = vmatprep.subr.mxu0 %v470_v0  ;;  %384 = vmatprep.subr.mxu1 %v470_v0 }
  0x3d   :  { %352 = vmatpush3.msra.mxu0 %v72_v42  ;;  %385 = vmatpush3.msra.mxu1 %v176_v54 }
  0x3e   :  { %354 = vmatmul.mubr.f32.vlgmr.msra.gmra.mxu0 %v98_v43  ;;  %386 = vmatprep.subr.mxu1 %v470_v0 }
  0x3f   :  { %387 = vmatpush3.msra.mxu1 %v175_v55 }
  0xfe   :  { %v166_v57 = vpop.f32.mrf.mxu0 }
  0xff   :  { %v167_v58 = vadd.f32 %v285_v56, %v166_v57 }
 0x100   :  { %v355_v59 = vpop.f32.mrf.mxu0 }
 0x101   :  { %v171_v60 = vmul.f32 0.70710677, %v167_v58  ;;  %v170_v62 = vmul.f32 0.5, %v167_v58 }
 0x103   :  { %398 = verf.f32 %v171_v60 }
 0x110   :  { %v399_v61 = vpop.eup %398 }
 0x111   :  { %v173_v63 = vadd.f32 1.0, %v399_v61 }
 0x113   :  { %v174_v1 = vmul.f32 %v173_v63, %v170_v62 }
 0x115   :  { %389 = vmatmul.mubr.f32.vlgmr.msra.gmra.mxu1 %v174_v1 }
 0x1d5   :  { %v264_v0 = vpop.f32.mrf.mxu1 }
 0x1d6   :  { %v265_v3 = vadd.f32 %v286_v2, %v264_v0 }
 0x1d7   :  { %v390_v4 = vpop.f32.mrf.mxu1 }
 0x1d8   :  { %268 = vst [vmem:[#allocation7] sm:$0x3] %v265_v3 }
 0x1d9   :  { %451 = shalt.err (!%p448_p0)
}
 0x1da   :  { %278 = dma.vmem_to_hbm [thread:$0]  %s276_s15, 32, %s569_s5, [#allocation4]  }
 0x1db   :  { %464 = dma.done.wait [#allocation4], 32  }
 0x1dc   :  { %465 = vsyncadd [#allocation4], 4294967264 }
 0x1dd   :  { %282 = vsyncpa [#allocation3], 1 }
 0x1de   :  { %283 = vsyncpa [#allocation6], 1 }
 0x1df   :  { %284 = vsyncpa [#allocation4], 1 }

</bundles_post_ra>
